<compile_context>
chip_gen: v6e
topology: v6e:2x2x1
jax: 0.10.0
libtpu: 0.0.40
codegen_flags: <defaults>
</compile_context>

<pallas_src>
import functools

import jax
import jax.numpy as jnp
from jax.experimental import pallas as pl
from jax.experimental.pallas import tpu as pltpu


def _round_up(x: int, m: int) -> int:
    return ((x + m - 1) // m) * m


def _entailment_loss_kernel(logits_ref, labels_ref, partial_ref, pred_ref, *,
                            batch: int, rows_per_tile: int):
    i = pl.program_id(0)

    # logits_ref: (3, rpt, 128) in original dtype; upcast + clamp in-kernel.
    # Class axis is the leading (untiled) dim -> these are cheap slices and
    # every intermediate below is a dense (rpt, 128) vreg array.
    x0 = jnp.clip(logits_ref[0].astype(jnp.float32), -100.0, 100.0)
    x1 = jnp.clip(logits_ref[1].astype(jnp.float32), -100.0, 100.0)
    x2 = jnp.clip(logits_ref[2].astype(jnp.float32), -100.0, 100.0)

    # Numerically stable 3-way log-sum-exp with only TWO exps: the max term's
    # exp(x_max - m) == 1 by construction, so sum = 1 + exp(g1) + exp(g2)
    # where g1, g2 are the two non-max gaps (a few extra VPU min/max selects).
    m01 = jnp.maximum(x0, x1)
    n01 = jnp.minimum(x0, x1)
    m = jnp.maximum(m01, x2)
    g1 = jnp.minimum(m01, x2) - m
    g2 = n01 - m
    lse = m + jnp.log(1.0 + jnp.exp(g1) + jnp.exp(g2))

    # labels in {-1,0,1} -> class index {0,1,2}; pick target logit with selects
    # (no iota / one-hot / gather).
    lab = labels_ref[...] + 1                                        # (rpt,128)
    target = jnp.where(lab == 0, x0, jnp.where(lab == 1, x1, x2))

    # Mask padded lanes / ragged last tile; out-of-range labels contribute 0
    # (torch would raise — documented deliberate deviation).  Mask BEFORE the
    # reduction so uninitialized tail data can never reach the sum.
    row = i * rows_per_tile + jax.lax.broadcasted_iota(jnp.int32, lab.shape, 0)
    lane = jax.lax.broadcasted_iota(jnp.int32, lab.shape, 1)
    elem = row * 128 + lane
    valid = (elem < batch) & (lab >= 0) & (lab <= 2)
    nll = jnp.where(valid, lse - target, 0.0)

    # Per-tile partial: sublane-only reduction -> lane-dense (1,128) row.
    partial_ref[0] = jnp.sum(nll, axis=0, keepdims=True)

    # argmax over the 3 classes, first-max tie-break (matches jnp/torch argmax).
    pred = jnp.where(x1 > x0, 1, 0)
    pred = jnp.where(x2 > m01, 2, pred)
    pred_ref[...] = (pred - 1).astype(jnp.int32)


def _entailment_loss_jax(logits, labels):
    """Plain-JAX reference / small-batch fallback."""
    x = jnp.clip(logits.astype(jnp.float32), -100.0, 100.0)
    idx = (labels + 1).astype(jnp.int32)
    logp = jax.nn.log_softmax(x, axis=1)
    nll = -jnp.take_along_axis(logp, idx[:, None], axis=1)[:, 0]
    loss = jnp.clip(jnp.mean(nll), -10.0, 10.0)
    preds = jnp.argmax(x, axis=1).astype(jnp.int32) - 1
    metrics = {"accuracy": jnp.mean((preds == labels).astype(jnp.float32))}
    return loss, preds, metrics


def entailment_loss(logits, labels, *, rows_per_tile: int = 1024, use_pallas=None):
    """EntailmentLoss.forward.

    Args:
        logits: [B, 3] float (any float dtype) class logits.
        labels: [B] int labels in {-1, 0, 1}.
        rows_per_tile: dense 128-lane rows per grid step (1024 ≈ 128K elems).
    Returns:
        (clipped_loss scalar f32, predictions [B] int32 in {-1,0,1}, metrics)
    """
    B, C = logits.shape
    assert C == 3, "EntailmentLoss expects 3 classes"
    labels = labels.astype(jnp.int32)

    if use_pallas is None:
        # TODO(synk): benchmark the crossover per TPU generation; while the
        # wrapper-side transpose/pad pre-pass exists the crossover sits well
        # above 1024 elements.
        use_pallas = B >= 4096
    if not use_pallas:
        return _entailment_loss_jax(logits, labels)

    # Pad only to a multiple of 128 (one dense lane row), NOT to a tile
    # multiple — the ragged last tile is handled by the in-kernel mask.
    b_pad = _round_up(B, 128)
    rows = b_pad // 128

    # Layout plumbing: batch on (sublane, lane) = (rows, 128), classes on the
    # leading (untiled) axis.  Keep the original float dtype across the DMA.
    # TODO(synk): ideally the producer emits logits already as [3, B] so this
    # transpose/pad HBM pass disappears entirely.
    logits_t = jnp.pad(logits.T, ((0, 0), (0, b_pad - B))).reshape(3, rows, 128)
    labels_p = jnp.pad(labels, (0, b_pad - B)).reshape(rows, 128)

    # Tile: multiple of 8 sublane rows (or the full extent for small batches).
    rpt_target = max(8, (rows_per_tile // 8) * 8)
    rpt = rows if rows <= rpt_target else rpt_target
    num_tiles = pl.cdiv(rows, rpt)

    kernel = functools.partial(_entailment_loss_kernel, batch=B, rows_per_tile=rpt)
    partials, preds = pl.pallas_call(
        kernel,
        out_shape=(
            jax.ShapeDtypeStruct((num_tiles, 1, 128), jnp.float32),
            jax.ShapeDtypeStruct((rows, 128), jnp.int32),
        ),
        grid=(num_tiles,),
        in_specs=[
            pl.BlockSpec((3, rpt, 128), lambda i: (0, i, 0)),
            pl.BlockSpec((rpt, 128), lambda i: (i, 0)),
        ],
        out_specs=(
            pl.BlockSpec((1, 1, 128), lambda i: (i, 0, 0)),
            pl.BlockSpec((rpt, 128), lambda i: (i, 0)),
        ),
        compiler_params=pltpu.CompilerParams(
            dimension_semantics=("parallel",),   # independent per-tile partials
        ),
    )(logits_t, labels_p)

    # Tiny scalar finalize in the wrapper: sum partials, mean over B, clamp.
    loss = jnp.clip(jnp.sum(partials) / jnp.float32(B), -10.0, 10.0)
    predictions = preds.reshape(-1)[:B]

    # TODO(synk): TreeMatchingMetrics.compute_task_metrics was not provided in
    # the module source; emit a simple accuracy metric instead (plain JAX glue).
    metrics = {"accuracy": jnp.mean((predictions == labels).astype(jnp.float32))}
    return loss, predictions, metrics


if __name__ == "__main__":
    key = jax.random.PRNGKey(0)
    k1, k2, k3, k4, k5, k6 = jax.random.split(key, 6)

    # Small case (B=8, f32) — force the Pallas path to exercise the kernel.
    B = 8
    logits = jax.random.normal(k1, (B, 3), dtype=jnp.float32) * 3.0
    labels = jax.random.randint(k2, (B,), minval=-1, maxval=2, dtype=jnp.int32)

    loss, preds, metrics = entailment_loss(logits, labels, use_pallas=True)
    jax.block_until_ready((loss, preds, metrics["accuracy"]))

    ref_loss, ref_preds, _ = _entailment_loss_jax(logits, labels)
    assert jnp.allclose(loss, ref_loss, atol=1e-5, rtol=1e-5), (loss, ref_loss)
    assert jnp.array_equal(preds, ref_preds), (preds, ref_preds)

    # Ragged lane case (B=300, bf16 logits) — exercises tail-lane masking and
    # the in-kernel upcast path.
    B2 = 300
    logits2 = jax.random.normal(k3, (B2, 3), dtype=jnp.bfloat16) * 3.0
    labels2 = jax.random.randint(k4, (B2,), minval=-1, maxval=2, dtype=jnp.int32)

    loss2, preds2, _ = entailment_loss(logits2, labels2, use_pallas=True)
    jax.block_until_ready((loss2, preds2))

    ref_loss2, ref_preds2, _ = _entailment_loss_jax(logits2, labels2)
    assert jnp.allclose(loss2, ref_loss2, atol=1e-4, rtol=1e-4), (loss2, ref_loss2)
    assert jnp.array_equal(preds2, ref_preds2), (preds2, ref_preds2)

    # Multi-tile + ragged last tile (B=2500, tiny 8-row tile) — exercises the
    # grid path / per-tile partials exactly as a large batch would.
    B3 = 2500
    logits3 = jax.random.normal(k5, (B3, 3), dtype=jnp.bfloat16) * 3.0
    labels3 = jax.random.randint(k6, (B3,), minval=-1, maxval=2, dtype=jnp.int32)

    loss3, preds3, _ = entailment_loss(logits3, labels3, rows_per_tile=8,
                                       use_pallas=True)
    jax.block_until_ready((loss3, preds3))

    ref_loss3, ref_preds3, _ = _entailment_loss_jax(logits3, labels3)
    assert jnp.allclose(loss3, ref_loss3, atol=1e-4, rtol=1e-4), (loss3, ref_loss3)
    assert jnp.array_equal(preds3, ref_preds3), (preds3, ref_preds3)

    print("KERNEL_OK")
</pallas_src>

<mosaic_0001>
module attributes {stable_mosaic.version = 11 : i64} {
  func.func @_entailment_loss_kernel(%arg0: i32, %arg1: memref<3x1x128xf32, #tpu.memory_space<vmem>>, %arg2: memref<1x128xi32, #tpu.memory_space<vmem>>, %arg3: memref<1x1x128xf32, #tpu.memory_space<vmem>>, %arg4: memref<1x128xi32, #tpu.memory_space<vmem>>) attributes {dimension_semantics = [#tpu.dimension_semantics<parallel>], iteration_bounds = array<i64: 1>, scalar_prefetch = 0 : i64, scratch_operands = 0 : i64, tpu.core_type = #tpu.core_type<tc>, window_params = [{transform_indices = @transform_0, window_bounds = array<i64: 3, 1, 128>}, {transform_indices = @transform_1, window_bounds = array<i64: 1, 128>}, {transform_indices = @transform_2, window_bounds = array<i64: 1, 1, 128>}, {transform_indices = @transform_3, window_bounds = array<i64: 1, 128>}]} {
    %c0 = arith.constant 0 : index
    %c0_0 = arith.constant 0 : index
    %c0_1 = arith.constant 0 : index
    %0 = vector.load %arg1[%c0, %c0_0, %c0_1] : memref<3x1x128xf32, #tpu.memory_space<vmem>>, vector<1x1x128xf32>
    %1 = vector.shape_cast %0 : vector<1x1x128xf32> to vector<1x128xf32>
    %cst = arith.constant -1.000000e+02 : f32
    %cst_2 = arith.constant 1.000000e+02 : f32
    %2 = vector.broadcast %cst : f32 to vector<1x128xf32>
    %3 = arith.maximumf %2, %1 : vector<1x128xf32>
    %4 = vector.broadcast %cst_2 : f32 to vector<1x128xf32>
    %5 = arith.minimumf %4, %3 : vector<1x128xf32>
    %c1 = arith.constant 1 : index
    %c0_3 = arith.constant 0 : index
    %c0_4 = arith.constant 0 : index
    %6 = vector.load %arg1[%c1, %c0_3, %c0_4] : memref<3x1x128xf32, #tpu.memory_space<vmem>>, vector<1x1x128xf32>
    %7 = vector.shape_cast %6 : vector<1x1x128xf32> to vector<1x128xf32>
    %cst_5 = arith.constant -1.000000e+02 : f32
    %cst_6 = arith.constant 1.000000e+02 : f32
    %8 = vector.broadcast %cst_5 : f32 to vector<1x128xf32>
    %9 = arith.maximumf %8, %7 : vector<1x128xf32>
    %10 = vector.broadcast %cst_6 : f32 to vector<1x128xf32>
    %11 = arith.minimumf %10, %9 : vector<1x128xf32>
    %c2 = arith.constant 2 : index
    %c0_7 = arith.constant 0 : index
    %c0_8 = arith.constant 0 : index
    %12 = vector.load %arg1[%c2, %c0_7, %c0_8] : memref<3x1x128xf32, #tpu.memory_space<vmem>>, vector<1x1x128xf32>
    %13 = vector.shape_cast %12 : vector<1x1x128xf32> to vector<1x128xf32>
    %cst_9 = arith.constant -1.000000e+02 : f32
    %cst_10 = arith.constant 1.000000e+02 : f32
    %14 = vector.broadcast %cst_9 : f32 to vector<1x128xf32>
    %15 = arith.maximumf %14, %13 : vector<1x128xf32>
    %16 = vector.broadcast %cst_10 : f32 to vector<1x128xf32>
    %17 = arith.minimumf %16, %15 : vector<1x128xf32>
    %18 = arith.maximumf %5, %11 : vector<1x128xf32>
    %19 = arith.minimumf %5, %11 : vector<1x128xf32>
    %20 = arith.maximumf %18, %17 : vector<1x128xf32>
    %21 = arith.minimumf %18, %17 : vector<1x128xf32>
    %22 = arith.subf %21, %20 : vector<1x128xf32>
    %23 = arith.subf %19, %20 : vector<1x128xf32>
    %24 = math.exp %22 : vector<1x128xf32>
    %cst_11 = arith.constant 1.000000e+00 : f32
    %25 = vector.broadcast %cst_11 : f32 to vector<1x128xf32>
    %26 = arith.addf %25, %24 : vector<1x128xf32>
    %27 = math.exp %23 : vector<1x128xf32>
    %28 = arith.addf %26, %27 : vector<1x128xf32>
    %29 = math.log %28 : vector<1x128xf32>
    %30 = arith.addf %20, %29 : vector<1x128xf32>
    %c0_12 = arith.constant 0 : index
    %c0_13 = arith.constant 0 : index
    %31 = vector.load %arg2[%c0_12, %c0_13] : memref<1x128xi32, #tpu.memory_space<vmem>>, vector<1x128xi32>
    %c1_i32 = arith.constant 1 : i32
    %32 = vector.broadcast %c1_i32 : i32 to vector<1x128xi32>
    %33 = arith.addi %31, %32 : vector<1x128xi32>
    %c0_i32 = arith.constant 0 : i32
    %34 = vector.broadcast %c0_i32 : i32 to vector<1x128xi32>
    %35 = arith.cmpi eq, %33, %34 : vector<1x128xi32>
    %c1_i32_14 = arith.constant 1 : i32
    %36 = vector.broadcast %c1_i32_14 : i32 to vector<1x128xi32>
    %37 = arith.cmpi eq, %33, %36 : vector<1x128xi32>
    %38 = arith.select %37, %11, %17 : vector<1x128xi1>, vector<1x128xf32>
    %39 = arith.select %35, %5, %38 : vector<1x128xi1>, vector<1x128xf32>
    %c1_i32_15 = arith.constant 1 : i32
    %40 = arith.muli %arg0, %c1_i32_15 : i32
    %41 = tpu.iota {dimensions = array<i32: 0>} : vector<1x128xi32>
    %42 = vector.broadcast %40 : i32 to vector<1x128xi32>
    %43 = arith.addi %42, %41 : vector<1x128xi32>
    %44 = tpu.iota {dimensions = array<i32: 1>} : vector<1x128xi32>
    %c128_i32 = arith.constant 128 : i32
    %45 = vector.broadcast %c128_i32 : i32 to vector<1x128xi32>
    %46 = arith.muli %43, %45 : vector<1x128xi32>
    %47 = arith.addi %46, %44 : vector<1x128xi32>
    %c8_i32 = arith.constant 8 : i32
    %48 = vector.broadcast %c8_i32 : i32 to vector<1x128xi32>
    %49 = arith.cmpi slt, %47, %48 : vector<1x128xi32>
    %c0_i32_16 = arith.constant 0 : i32
    %50 = vector.broadcast %c0_i32_16 : i32 to vector<1x128xi32>
    %51 = arith.cmpi sge, %33, %50 : vector<1x128xi32>
    %52 = arith.andi %49, %51 : vector<1x128xi1>
    %c2_i32 = arith.constant 2 : i32
    %53 = vector.broadcast %c2_i32 : i32 to vector<1x128xi32>
    %54 = arith.cmpi sle, %33, %53 : vector<1x128xi32>
    %55 = arith.andi %52, %54 : vector<1x128xi1>
    %56 = arith.subf %30, %39 : vector<1x128xf32>
    %cst_17 = arith.constant 0.000000e+00 : f32
    %57 = vector.broadcast %cst_17 : f32 to vector<1x128xf32>
    %58 = arith.select %55, %56, %57 : vector<1x128xi1>, vector<1x128xf32>
    %cst_18 = arith.constant dense<0.000000e+00> : vector<128xf32>
    %59 = vector.multi_reduction <add>, %58, %cst_18 [0] : vector<1x128xf32> to vector<128xf32>
    %60 = vector.shape_cast %59 : vector<128xf32> to vector<1x128xf32>
    %c0_19 = arith.constant 0 : index
    %c0_20 = arith.constant 0 : index
    %c0_21 = arith.constant 0 : index
    %61 = vector.load %arg3[%c0_19, %c0_20, %c0_21] : memref<1x1x128xf32, #tpu.memory_space<vmem>>, vector<1x1x128xf32>
    %62 = vector.shape_cast %61 : vector<1x1x128xf32> to vector<1x128xf32>
    %63 = vector.shape_cast %60 : vector<1x128xf32> to vector<1x1x128xf32>
    tpu.vector_store %arg3[%c0_19, %c0_20, %c0_21], %63 {strides = array<i32>} : memref<1x1x128xf32, #tpu.memory_space<vmem>>, vector<1x1x128xf32>,
    %64 = arith.cmpf ogt, %11, %5 : vector<1x128xf32>
    %c1_i32_22 = arith.constant 1 : i32
    %c0_i32_23 = arith.constant 0 : i32
    %65 = vector.broadcast %c1_i32_22 : i32 to vector<1x128xi32>
    %66 = vector.broadcast %c0_i32_23 : i32 to vector<1x128xi32>
    %67 = arith.select %64, %65, %66 : vector<1x128xi1>, vector<1x128xi32>
    %68 = arith.cmpf ogt, %17, %18 : vector<1x128xf32>
    %c2_i32_24 = arith.constant 2 : i32
    %69 = vector.broadcast %c2_i32_24 : i32 to vector<1x128xi32>
    %70 = arith.select %68, %69, %67 : vector<1x128xi1>, vector<1x128xi32>
    %c1_i32_25 = arith.constant 1 : i32
    %71 = vector.broadcast %c1_i32_25 : i32 to vector<1x128xi32>
    %72 = arith.subi %70, %71 : vector<1x128xi32>
    %c0_26 = arith.constant 0 : index
    %c0_27 = arith.constant 0 : index
    %73 = vector.load %arg4[%c0_26, %c0_27] : memref<1x128xi32, #tpu.memory_space<vmem>>, vector<1x128xi32>
    tpu.vector_store %arg4[%c0_26, %c0_27], %72 {strides = array<i32>} : memref<1x128xi32, #tpu.memory_space<vmem>>, vector<1x128xi32>,
    return
  }
  func.func @transform_0(%arg0: i32) -> (i32, i32, i32) {
    %c0_i32 = arith.constant 0 : i32
    %c0_i32_0 = arith.constant 0 : i32
    %c0_i32_1 = arith.constant 0 : i32
    return %c0_i32, %arg0, %c0_i32_0 : i32, i32, i32
  }
  func.func @transform_1(%arg0: i32) -> (i32, i32) {
    %c0_i32 = arith.constant 0 : i32
    %c0_i32_0 = arith.constant 0 : i32
    return %arg0, %c0_i32 : i32, i32
  }
  func.func @transform_2(%arg0: i32) -> (i32, i32, i32) {
    %c0_i32 = arith.constant 0 : i32
    %c0_i32_0 = arith.constant 0 : i32
    %c0_i32_1 = arith.constant 0 : i32
    return %arg0, %c0_i32, %c0_i32_0 : i32, i32, i32
  }
  func.func @transform_3(%arg0: i32) -> (i32, i32) {
    %c0_i32 = arith.constant 0 : i32
    %c0_i32_0 = arith.constant 0 : i32
    return %arg0, %c0_i32 : i32, i32
  }
}

</mosaic_0001>

<bundles_post_ra>
// kernel: tpu_custom_call.1
= control target key start
LH: loop header
LB: loop body
LE: loop exit
PB: predicated region body
PF: predicated region fallthrough
CT: control target
= control target key end

     0   :  { %9 = vsyncpa [#allocation3], 0  ;;  %s233_s0 = inlined_call_operand.hbm [shape: f32[3,1,128], index: 0, kind: input, shape index: {}]   ;;  %s234_s1 = inlined_call_operand.vmem [shape: s32[1,128], index: 1, kind: input, shape index: {}]   ;;  %s235_s2 = inlined_call_operand.hbm [shape: f32[1,1,128], index: 2, kind: output, shape index: {0}]   ;;  %s236_s3 = inlined_call_operand.hbm [shape: s32[1,128], index: 3, kind: output, shape index: {1}]  }
   0x1   :  { %10 = vsyncpa [#allocation4], 0 }
   0x2   :  { %11 = vsyncpa [#allocation7], 0  ;;  %s195_s12 = smov [#allocation2]  }
   0x3   :  { %s17_s13 = sshll.u32 %s195_s12, 4  ;;  %s18_s13 = int_to_ptr.vmem [resolvable:$true] %s17_s13 }
   0x4   :  { %s137_s14 = scalar_lea.vmem %s18_s13, 48  ;;  %s141_s15 = scalar_lea.vmem %s18_s13, 64 }
   0x5   :  { %p138_p0 = scmp.ne.s32.totalorder %s18_s13, %s137_s14  ;;  %p142_p1 = scmp.lt.s32.totalorder %s18_s13, %s18_s13 }
   0x6   :  { %p143_p2 = scmp.lt.s32.totalorder %s141_s15, %s137_s14 }
   0x8   :  { %p144_p3 = por %p143_p2, %p142_p1 }
   0xa   :  { %p145_p4 = pnand %p144_p3, %p138_p0 }
   0xc   :  { %148 = shalt.err (!%p145_p4)
}
   0xd   :  { %s196_s16 = smov 16   ;;  %s197_s17 = smov 1  }
   0xe   :  { %23 = dma.hbm_to_vmem [thread:$0]  %s233_s0, 48, %s18_s13, [#allocation3], %s196_s16, %s196_s16, %s197_s17  }
   0xf   :  { %189 = dma.done.wait [#allocation3], 48  }
  0x10   :  { %190 = vsyncadd [#allocation3], 4294967248  ;;  %v29_v0 = vld [vmem:[#allocation2] sm:$0x1]  ;;  %v33_v1 = vld [vmem:[#allocation2 + $0x1] sm:$0x1] }
  0x11   :  { %v37_v2 = vld [vmem:[#allocation2 + $0x2] sm:$0x1]  ;;  %v113_v3 = vclamps-f32 %v29_v0, 100.0  ;;  %v114_v4 = vclamps-f32 %v33_v1, 100.0  ;;  %v198_v10 = vmov 0   ;;  %s199_s20 = smov [#allocation6]  }
  0x12   :  { %v115_v5 = vclamps-f32 %v37_v2, 100.0  ;;  %s100_s21 = sshll.u32 %s199_s20, 4  ;;  %s101_s21 = int_to_ptr.vmem [resolvable:$true] %s100_s21 }
  0x13   :  { %v40_v6 = vmax.f32 %v113_v3, %v114_v4  ;;  %v41_v7 = vmin.f32 %v113_v3, %v114_v4  ;;  %vm78_vm0 = vcmp.gt.f32.partialorder %v114_v4, %v113_v3  ;;  %s149_s0 = scalar_lea.vmem %s101_s21, 16  ;;  %s153_s22 = scalar_lea.vmem %s101_s21, 32 }
  0x14   :  { %v79_v11 = vsel %vm78_vm0, 1, %v198_v10  ;;  %p150_p5 = scmp.ne.s32.totalorder %s101_s21, %s149_s0  ;;  %p154_p6 = scmp.lt.s32.totalorder %s101_s21, %s101_s21 }
  0x15   :  { %v42_v8 = vmax.f32 %v40_v6, %v115_v5  ;;  %v43_v9 = vmin.f32 %v40_v6, %v115_v5  ;;  %vm80_vm1 = vcmp.gt.f32.partialorder %v115_v5, %v40_v6  ;;  %p155_p7 = scmp.lt.s32.totalorder %s153_s22, %s149_s0 }
  0x16   :  { %v81_v14 = vsel %vm80_vm1, 2, %v79_v11 }
  0x17   :  { %v44_v12 = vsub.f32 %v43_v9, %v42_v8  ;;  %v45_v13 = vsub.f32 %v41_v7, %v42_v8  ;;  %v116_v15 = vadd.s32 4294967295, %v81_v14  ;;  %p156_p8 = por %p155_p7, %p154_p6 }
  0x19   :  { %v46_v16 = vmul.f32 1.442695, %v44_v12  ;;  %v49_v17 = vmul.f32 1.442695, %v45_v13  ;;  %83 = vst [vmem:[#allocation6] sm:$0x1] %v116_v15  ;;  %p157_p9 = pnand %p156_p8, %p150_p5 }
  0x1b   :  { %123 = vpow2.f32 %v46_v16 }
  0x1c   :  { %160 = shalt.err (!%p157_p9)
}
  0x1d   :  { %103 = dma.vmem_to_hbm [thread:$0]  %s101_s21, 16, %s236_s3, [#allocation7]   ;;  %125 = vpow2.f32 %v49_v17  ;;  %v61_v19 = vlaneseq  ;;  %v55_v24 = vld [vmem:[%s234_s1] sm:$0x1] }
  0x1e   :  { %v56_v27 = vadd.s32 1, %v55_v24  ;;  %s200_s3 = smov [#allocation5]  }
  0x1f   :  { %v62_v23 = vshrl.u32 %v61_v19, 7  ;;  %v66_v25 = vand.u32 127, %v61_v19  ;;  %s90_s27 = sshll.u32 %s200_s3, 4  ;;  %s91_s27 = int_to_ptr.vmem [resolvable:$true] %s90_s27 }
  0x20   :  { %vm58_vm2 = vcmp.eq.s32.totalorder %v56_v27, 1  ;;  %vm70_vm4 = vcmp.ge.s32.totalorder %v56_v27, 0  ;;  %vm57_vm5 = vcmp.eq.s32.totalorder %v56_v27, 0  ;;  %vm72_vm7 = vcmp.le.s32.totalorder %v56_v27, 2  ;;  %s169_s1 = scalar_lea.vmem %s91_s27, 16  ;;  %s173_s28 = scalar_lea.vmem %s91_s27, 32 }
  0x21   :  { %v67_v26 = vmul.u32 128, %v62_v23  ;;  %v59_v29 = vsel %vm58_vm2, %v114_v4, %v115_v5  ;;  %p170_p10 = scmp.ne.s32.totalorder %s91_s27, %s169_s1  ;;  %p174_p11 = scmp.lt.s32.totalorder %s91_s27, %s91_s27 }
  0x22   :  { %v60_v32 = vsel %vm57_vm5, %v113_v3, %v59_v29  ;;  %p175_p12 = scmp.lt.s32.totalorder %s173_s28, %s169_s1 }
  0x23   :  { %v68_v28 = vadd.s32 %v67_v26, %v66_v25 }
  0x24   :  { %p176_p13 = por %p175_p12, %p174_p11 }
  0x25   :  { %vm69_vm3 = vcmp.lt.s32.totalorder %v68_v28, 8 }
  0x26   :  { %vm71_vm6 = vmand %vm69_vm3, %vm70_vm4  ;;  %p177_p0 = pnand %p176_p13, %p170_p10 }
  0x27   :  { %vm73_vm8 = vmand %vm71_vm6, %vm72_vm7 }
  0x28   :  { %v124_v18 = vpop.eup %123 }
  0x29   :  { %v48_v21 = vadd.f32 1.0, %v124_v18 }
  0x2a   :  { %v126_v20 = vpop.eup %125 }
  0x2b   :  { %v51_v22 = vadd.f32 %v126_v20, %v48_v21 }
  0x2d   :  { %127 = vlog2.f32 %v51_v22 }
  0x3a   :  { %v128_v30 = vpop.eup %127 }
  0x3b   :  { %v53_v31 = vmul.f32 0.6931472, %v128_v30 }
  0x3d   :  { %v54_v33 = vadd.f32 %v53_v31, %v42_v8 }
  0x3f   :  { %v74_v34 = vsub.f32 %v54_v33, %v60_v32 }
  0x41   :  { %v75_v35 = vsel %vm73_vm8, %v74_v34, 0.0 }
  0x42   :  { %77 = vst [vmem:[#allocation5] sm:$0x1] %v75_v35 }
  0x43   :  { %180 = shalt.err (!%p177_p0)
}
  0x44   :  { %93 = dma.vmem_to_hbm [thread:$0]  %s91_s27, 16, %s235_s2, [#allocation4]  }
  0x45   :  { %191 = dma.done.wait [#allocation4], 16  }
  0x46   :  { %192 = vsyncadd [#allocation4], 4294967280 }
  0x47   :  { %193 = dma.done.wait [#allocation7], 16  }
  0x48   :  { %194 = vsyncadd [#allocation7], 4294967280 }
  0x49   :  { %110 = vsyncpa [#allocation3], 1 }
  0x4a   :  { %111 = vsyncpa [#allocation4], 1 }
  0x4b   :  { %112 = vsyncpa [#allocation7], 1 }

</bundles_post_ra>
